<compile_context>
chip_gen: v6e
topology: v6e:2x2x1
jax: 0.10.0
libtpu: 0.0.40
codegen_flags: <defaults>
</compile_context>

<pallas_src>
import functools

import jax
import jax.numpy as jnp
from jax.experimental import pallas as pl
from jax.experimental.pallas import tpu as pltpu


def _linear_residual_kernel(x_ref, wt_ref, b_ref, o_ref):
    # x_ref : (TM, D)  VMEM row tile (pipelined)
    # wt_ref: (D, D)   VMEM, pre-transposed weight (in_features, out_features), resident
    # b_ref : (1, D)   VMEM, resident
    # o_ref : (TM, D)  VMEM
    x = x_ref[...]
    # MXU matmul with f32 accumulation, standard ((1,),(0,)) contraction
    # because the constant weight was transposed once at param-init time.
    y = jnp.dot(x, wt_ref[...], preferred_element_type=jnp.float32)
    # Fused bias + residual add.
    o_ref[...] = (y + b_ref[...] + x).astype(o_ref.dtype)


def prepare_linear_params(weight, bias):
    """One-time (parameter-init) transform of the nn.Linear params.

    Pre-transposes the constant (D_out, D_in) weight so the kernel uses the
    standard contraction (no hidden per-grid-step transpose), and reshapes the
    bias to a 2-D row. This is hoisted out of the per-call path on purpose.
    """
    return jnp.asarray(weight.T), jnp.asarray(bias).reshape(1, -1)


def _choose_tm(n, tm_max):
    # Row tile: multiple of 8 (sublane), capped by tm_max (VMEM / pipelining),
    # and at most ~n/2 so the row grid has >=2 points (keeps both TensorCores
    # busy on v7x; harmless on single-TC v5e/v6e).
    half = -(-n // 2)                       # cdiv(n, 2)
    tm = ((half + 7) // 8) * 8
    return max(8, min(tm_max, tm))


@functools.partial(jax.jit, static_argnames=("tm_max",))
def linear_residual(x, w_t, b_row, *, tm_max=1024):
    """y = x @ W.T + b + x, fused in a single Pallas TPU kernel.

    x:     (N, D) float32
    w_t:   (D, D) float32   pre-transposed weight (in_features, out_features)
    b_row: (1, D) float32
    """
    n, d = x.shape
    assert w_t.shape == (d, d), "residual add requires out_features == in_features"
    assert b_row.shape == (1, d)

    tm = _choose_tm(n, tm_max)
    grid = (pl.cdiv(n, tm),)                # partial trailing row-block is masked

    itemsize = jnp.dtype(x.dtype).itemsize
    cost = pl.CostEstimate(
        flops=2 * n * d * d,
        transcendentals=0,
        bytes_accessed=(2 * n * d + d * d + d) * itemsize,
    )

    # TODO(synk): for very large N it may pay to lane-pad 80->128 at the
    # producer (lane-dense unmasked stores) — benchmark vs. this 80-lane
    # variant, which minimizes HBM bytes for this bandwidth-bound op.
    return pl.pallas_call(
        _linear_residual_kernel,
        out_shape=jax.ShapeDtypeStruct((n, d), x.dtype),
        grid=grid,
        in_specs=[
            pl.BlockSpec((tm, d), lambda i: (i, 0)),   # x: pipelined row tiles
            pl.BlockSpec((d, d), lambda i: (0, 0)),    # weight: resident
            pl.BlockSpec((1, d), lambda i: (0, 0)),    # bias: resident
        ],
        out_specs=pl.BlockSpec((tm, d), lambda i: (i, 0)),
        compiler_params=pltpu.CompilerParams(
            dimension_semantics=("parallel",),
        ),
        cost_estimate=cost,
    )(x, w_t, b_row)


if __name__ == "__main__":
    # Small shapes consistent with the module's forward (batch=20 rows,
    # square feature dim so the residual add is well-defined — see TODO above).
    N, D = 20, 80

    key = jax.random.PRNGKey(0)
    kx, kw, kb = jax.random.split(key, 3)

    x = jax.random.normal(kx, (N, D), dtype=jnp.float32)

    # Deterministic nn.Linear-style init: U(-1/sqrt(fan_in), 1/sqrt(fan_in)).
    bound = 1.0 / (D ** 0.5)
    weight = jax.random.uniform(kw, (D, D), jnp.float32, -bound, bound)
    bias = jax.random.uniform(kb, (D,), jnp.float32, -bound, bound)

    # One-time parameter prep (hoisted out of the per-call path).
    w_t, b_row = prepare_linear_params(weight, bias)

    y = linear_residual(x, w_t, b_row)
    jax.block_until_ready(y)

    # Reference check (pure JAX) to validate kernel semantics.
    y_ref = x @ weight.T + bias + x
    assert y.shape == (N, D)
    assert jnp.allclose(y, y_ref, atol=1e-5, rtol=1e-5)

    print("KERNEL_OK")
</pallas_src>

<mosaic_0001>
module attributes {stable_mosaic.version = 11 : i64} {
  func.func @_linear_residual_kernel(%arg0: i32, %arg1: memref<16x80xf32, #tpu.memory_space<vmem>>, %arg2: memref<80x80xf32, #tpu.memory_space<vmem>>, %arg3: memref<1x80xf32, #tpu.memory_space<vmem>>, %arg4: memref<16x80xf32, #tpu.memory_space<vmem>>) attributes {dimension_semantics = [#tpu.dimension_semantics<parallel>], iteration_bounds = array<i64: 2>, scalar_prefetch = 0 : i64, scratch_operands = 0 : i64, tpu.core_type = #tpu.core_type<tc>, window_params = [{transform_indices = @transform_0, window_bounds = array<i64: 16, 80>}, {pipeline_mode = #tpu.pipeline_mode<synchronous>, transform_indices = @transform_1, window_bounds = array<i64: 80, 80>}, {pipeline_mode = #tpu.pipeline_mode<synchronous>, transform_indices = @transform_2, window_bounds = array<i64: 1, 80>}, {transform_indices = @transform_3, window_bounds = array<i64: 16, 80>}]} {
    %c0 = arith.constant 0 : index
    %c0_0 = arith.constant 0 : index
    %0 = vector.load %arg1[%c0, %c0_0] : memref<16x80xf32, #tpu.memory_space<vmem>>, vector<16x80xf32>
    %c0_1 = arith.constant 0 : index
    %c0_2 = arith.constant 0 : index
    %1 = vector.load %arg2[%c0_1, %c0_2] : memref<80x80xf32, #tpu.memory_space<vmem>>, vector<80x80xf32>
    %cst = arith.constant dense<0.000000e+00> : vector<16x80xf32>
    %2 = tpu.matmul %0, %1, %cst {dimension_numbers = #tpu.dot_dimension_numbers<[1], [0], [0], [1], [0, 0, 1, 1], [], []>} : vector<16x80xf32>, vector<80x80xf32>, vector<16x80xf32> -> vector<16x80xf32>
    %c0_3 = arith.constant 0 : index
    %c0_4 = arith.constant 0 : index
    %3 = vector.load %arg3[%c0_3, %c0_4] : memref<1x80xf32, #tpu.memory_space<vmem>>, vector<1x80xf32>
    %4 = vector.broadcast %3 : vector<1x80xf32> to vector<16x80xf32>
    %5 = arith.addf %2, %4 : vector<16x80xf32>
    %6 = arith.addf %5, %0 : vector<16x80xf32>
    %c0_5 = arith.constant 0 : index
    %c0_6 = arith.constant 0 : index
    %7 = vector.load %arg4[%c0_5, %c0_6] : memref<16x80xf32, #tpu.memory_space<vmem>>, vector<16x80xf32>
    tpu.vector_store %arg4[%c0_5, %c0_6], %6 {strides = array<i32>} : memref<16x80xf32, #tpu.memory_space<vmem>>, vector<16x80xf32>,
    return
  }
  func.func @transform_0(%arg0: i32) -> (i32, i32) {
    %c0_i32 = arith.constant 0 : i32
    %c0_i32_0 = arith.constant 0 : i32
    return %arg0, %c0_i32 : i32, i32
  }
  func.func @transform_1(%arg0: i32) -> (i32, i32) {
    %c0_i32 = arith.constant 0 : i32
    %c0_i32_0 = arith.constant 0 : i32
    %c0_i32_1 = arith.constant 0 : i32
    return %c0_i32, %c0_i32_0 : i32, i32
  }
  func.func @transform_2(%arg0: i32) -> (i32, i32) {
    %c0_i32 = arith.constant 0 : i32
    %c0_i32_0 = arith.constant 0 : i32
    %c0_i32_1 = arith.constant 0 : i32
    return %c0_i32, %c0_i32_0 : i32, i32
  }
  func.func @transform_3(%arg0: i32) -> (i32, i32) {
    %c0_i32 = arith.constant 0 : i32
    %c0_i32_0 = arith.constant 0 : i32
    return %arg0, %c0_i32 : i32, i32
  }
}

</mosaic_0001>

<bundles_post_ra>
// kernel: linear_residual.1
= control target key start
LH: loop header
LB: loop body
LE: loop exit
PB: predicated region body
PF: predicated region fallthrough
CT: control target
= control target key end

     0   :  { %8 = vsyncpa [#allocation3], 0  ;;  %s907_s0 = inlined_call_operand.hbm [shape: f32[20,80], index: 0, kind: input, shape index: {}]   ;;  %s908_s1 = inlined_call_operand.hbm [shape: f32[80,80], index: 1, kind: input, shape index: {}]   ;;  %s909_s2 = inlined_call_operand.vmem [shape: f32[1,80], index: 2, kind: input, shape index: {}]   ;;  %s910_s3 = inlined_call_operand.hbm [shape: f32[20,80], index: 3, kind: output, shape index: {}]  }
   0x1   :  { %10 = vsyncpa [#allocation3 + $0x1], 0 }
   0x2   :  { %11 = vsyncpa [#allocation6], 0 }
   0x3   :  { %12 = vsyncpa [#allocation4], 0 }
   0x4   :  { %14 = vsyncpa [#allocation4 + $0x1], 0  ;;  %s699_s12 = smov 0   ;;  %s701_s13 = smov 0  }
   0x5   :  { %s703_s14 = smov 0   ;;  %s705_s15 = smov 0  }
   0x6 LB: > { %s720_s16 = sadd.s32 4294967295, %s668_s15   ;;  %s428_s17 = sadd.s32 4294967294, %s668_s15   ;;  %s668_s15 = sphi %s705_s15, %s925_s15   ;;  %s664_s14 = sphi %s703_s14, %s924_s14   ;;  %s660_s13 = sphi %s701_s13, %s923_s13   ;;  %s656_s12 = sphi %s699_s12, %s922_s12  }
   0x7   : > { %s724_s18 = sadd.s32 1, %s668_s15   ;;  %s27_s19 = sadd.s32 1, %s664_s14 }
   0x8   : > { %s24_s20 = ssub.s32 %s668_s15, %s724_s18  ;;  %p34_p0 = scmp.ne.s32.totalorder %s664_s14, %s660_s13 }
   0x9   : > { %p25_p1 = scmp.eq.s32.totalorder %s24_s20, 0  ;;  %p35_p2 = scmp.eq.s32.totalorder %s668_s15, 0 }
   0xa   : > { %p40_p3 = scmp.ne.s32.totalorder %s660_s13, %s656_s12  ;;  %p41_p4 = scmp.eq.s32.totalorder %s720_s16, 0 }
   0xb   : > { %s736_s21 = scalar_select %p25_p1, %s664_s14, %s27_s19  }
   0xc   : > { %p738_p5 = por %p35_p2, %p34_p0  ;;  %p744_p6 = por %p41_p4, %p40_p3 }
   0xd   : > { %p106_p7 = scmp.eq.s32.totalorder %s720_s16, 1  ;;  %p112_p8 = scmp.eq.s32.totalorder %s428_s17, 1 }
   0xe   : > { %s914_s23 = scalar_select %p744_p6, 1, 0 }
   0xf   : > { %p429_p9 = scmp.ge.s32.totalorder %s668_s15, 1  ;;  %p119_p10 = scmp.lt.s32.totalorder %s668_s15, 3 }
  0x10   : > { %p751_p11 = por %p106_p7, %p34_p0  ;;  %p755_p12 = por %p112_p8, %p40_p3 }
  0x11   : > { %p759_p13 = pnand %p429_p9, %p119_p10  ;;  %s670_s27 = smov [#allocation5]  }
  0x12   : > { %s915_s24 = scalar_select %p751_p11, 1, 0 }
  0x13   : > { %s916_s25 = scalar_select %p755_p12, 1, 0 }
  0x14   : > { %p498_p1 = pneg %p759_p13  ;;  %s131_s28 = sshll.u32 %s670_s27, 4  ;;  %s132_s28 = int_to_ptr.vmem [resolvable:$true] %s131_s28 }
  0x15   : > { %s559_s29 = scalar_lea.vmem %s132_s28, 1280  ;;  %p567_p8 = scmp.lt.s32.totalorder %s132_s28, %s132_s28 }
  0x16   : > { %p499_p2 = pnand %p498_p1, %p41_p4  ;;  %p560_p7 = scmp.ne.s32.totalorder %s132_s28, %s559_s29 }
  0x17   : > { %p568_p6 = scmp.lt.s32.totalorder %s559_s29, %s559_s29 }
  0x18   : > { %p550_p0 = pneg %p499_p2 }
  0x19   : > { %p569_p12 = por %p568_p6, %p567_p8 }
  0x1a   : > { %p562_p11 = pnand %p560_p7, %p550_p0 }
  0x1c   : > { %p563_p3 = pneg %p562_p11 }
  0x1e   : > { %p570_p9 = pnand %p569_p12, %p563_p3 }
  0x20   : > { %573 = shalt.err (!%p570_p9)
}
  0x21   : > { %s671_s30 = smov 128   ;;  %s672_s4 = smov 8  }
  0x22   : > { %501 = dma.hbm_to_vmem [thread:$0]  (!%p499_p2), %s908_s1, 1280, %s132_s28, [#allocation6], %s671_s30, %s671_s30, %s672_s4  }
  0x23   : > { %p912_p10 = scmp.ge.s32.totalorder %s668_s15, 2 }
  0x25   : > { %144 = sbr.rel (%p912_p10) target bundleno = 74 (0x4a), region = 24 }
  0x2a   : > { %147 = sbr.rel (!%p738_p5) target bundleno = 74 (0x4a), region = 28  ;;  %s148_s7 = sand.u32 (%p738_p5), 1, %s664_s14  }
  0x2b   : > { %s433_s8 = sshll.u32 (%p738_p5), %s668_s15, 1  ;;  %s432_s9 = sshll.u32 (%p738_p5), %s148_s7, 4 }
  0x2c   : > { %s154_s10 = ssub.s32 (%p738_p5), 3, %s433_s8  ;;  %s780_s19 = scalar_lea.sflag (%p738_p5), [#allocation3], %s148_s7 }
  0x2d   : > { %p155_p6 = scmp.lt.s32.totalorder (%p738_p5), %s154_s10, 2  ;;  %s152_s20 = scalar_lea.vmem (%p738_p5), [#allocation2], %s432_s9 }
  0x2f   : > { %s927_s10 = smov (!%p155_p6, %s154_s10), 2 }
  0x30   : > { %s777_s11 = sshll.u32 %s927_s10, 7 }
  0x31   : > { %s159_s17 = ssub.s32 256, %s777_s11 }
  0x32   : > { %160 = vsyncadd %s780_s19, %s159_s17  ;;  %p435_p5 = scmp.ne.s32.totalorder %s777_s11, 0  ;;  %s455_s22 = sshll.u32 %s668_s15, 8 }
  0x33   : > { %s788_s29 = scalar_lea.hbm %s907_s0, %s455_s22  ;;  %s165_s30 = sshll.u32 %s152_s20, 4  ;;  %s790_s30 = int_to_ptr.vmem [resolvable:$true] %s165_s30 }
  0x34   : > { %s574_s4 = scalar_lea.hbm %s788_s29, %s777_s11  ;;  %s578_s7 = scalar_lea.hbm %s907_s0, 384 }
  0x35   : > { %p575_p11 = scmp.ne.s32.totalorder %s788_s29, %s574_s4  ;;  %p579_p2 = scmp.lt.s32.totalorder %s788_s29, %s907_s0 }
  0x36   : > { %p580_p0 = scmp.lt.s32.totalorder %s578_s7, %s574_s4 }
  0x37   : > { %p576_p12 = pnand %p575_p11, %p435_p5 }
  0x38   : > { %p581_p7 = por %p580_p0, %p579_p2 }
  0x39   : > { %p577_p1 = pneg %p576_p12 }
  0x3b   : > { %p582_p3 = pnand %p581_p7, %p577_p1 }
  0x3d   : > { %585 = shalt.err (!%p582_p3)
}
  0x3e   : > { %s586_s10 = scalar_lea.vmem %s790_s30, %s777_s11  ;;  %s673_s17 = smov [#allocation2]  }
  0x3f   : > { %p587_p8 = scmp.ne.s32.totalorder %s790_s30, %s586_s10  ;;  %s590_s20 = sshll.u32 %s673_s17, 4  ;;  %s591_s20 = int_to_ptr.vmem [resolvable:$false] %s590_s20 }
  0x40   : > { %s592_s22 = scalar_lea.vmem %s591_s20, 512  ;;  %p593_p11 = scmp.lt.s32.totalorder %s790_s30, %s591_s20 }
  0x41   : > { %p588_p9 = pnand %p587_p8, %p435_p5  ;;  %p594_p12 = scmp.lt.s32.totalorder %s592_s22, %s586_s10 }
  0x43   : > { %p589_p6 = pneg %p588_p9  ;;  %p595_p10 = por %p594_p12, %p593_p11 }
  0x45   : > { %p596_p2 = pnand %p595_p10, %p589_p6 }
  0x47   : > { %599 = shalt.err (!%p596_p2)
}
  0x48   : > { %s674_s27 = smov 128   ;;  %s675_s28 = smov 8  }
  0x49   : > { %171 = dma.hbm_to_vmem [thread:$0]  (%p435_p5), %s788_s29, %s777_s11, %s790_s30, %s780_s19, %s674_s27, %s674_s27, %s675_s28  }
  0x4a PF: > { %177 = sbr.rel (%p759_p13) target bundleno = 330 (0x14a), region = 32  ;;  %s819_s4 = sand.u32 (!%p759_p13), 1, %s660_s13  }
  0x4b   : > { %s440_s5 = sshll.u32 (!%p759_p13), %s819_s4, 4  ;;  %s180_s6 = scalar_lea.sflag (!%p759_p13), [#allocation3], %s819_s4 }
  0x4c   : > { %s825_s7 = scalar_lea.vmem (!%p759_p13), [#allocation2], %s440_s5  ;;  %p918_p10 = scmp.ne.s32.totalorder (!%p759_p13), %s914_s23, 0 }
  0x4f   : > { %643 = dma.done.wait (%p918_p10), %s180_s6, 256  }
  0x50   : > { %645 = vsyncadd (%p918_p10), %s180_s6, 4294967040 }
  0x51   : > { %647 = dma.done.wait (%p41_p4), [#allocation6], 1280  }
  0x52   : > { %649 = vsyncadd (%p41_p4), [#allocation6], 4294966016  ;;  %v231_v0 = vld [vmem:[#allocation5 + $0x48] sm:$0xff]  ;;  %v230_v1 = vld [vmem:[#allocation5 + $0x40] sm:$0xff]  ;;  %vm239_vm0 = vcmask 654336   ;;  %s209_s11 = scalar_lea.vmem [#allocation7], %s440_s5 }
  0x53   : > { %469 = vmatprep.subr.mxu0 %v231_v0  ;;  %v229_v2 = vld [vmem:[#allocation5 + $0x38] sm:$0xff]  ;;  %v220_v3 = vld [vmem:[%s825_s7] sm:$0xff]  ;;  %v227_v5 = vld [vmem:[#allocation5 + $0x28] sm:$0xff]  ;;  %s326_s19 = scalar_lea.sflag [#allocation4], %s819_s4  ;;  %p919_p4 = scmp.ne.s32.totalorder %s915_s24, 0 }
  0x54   : > { %470 = vmatpush3.msra.mxu0 %v231_v0  ;;  %v228_v4 = vld [vmem:[#allocation5 + $0x30] sm:$0xff]  ;;  %489 = vmatprep.mubr.msk.f32.mxu0 %vm239_vm0, %v220_v3  ;;  %v226_v6 = vld [vmem:[#allocation5 + $0x20] sm:$0xff]  ;;  %v225_v7 = vld [vmem:[#allocation5 + $0x18] sm:$0xff]  ;;  %s447_s29 = sshll.u32 (%p919_p4), %s720_s16, 1 }
  0x55   : > { %471 = vmatprep.subr.mxu0 %v230_v1  ;;  %v224_v8 = vld [vmem:[#allocation5 + $0x10] sm:$0xff]  ;;  %v223_v9 = vld [vmem:[#allocation5 + $0x8] sm:$0xff]  ;;  %v222_v10 = vld [vmem:[#allocation5] sm:$0xff]  ;;  %s334_s30 = ssub.s32 (%p919_p4), 3, %s447_s29 }
  0x56   : > { %472 = vmatpush3.msra.mxu0 %v230_v1  ;;  %v221_v11 = vld [vmem:[%s825_s7 + $0x8] sm:$0xff]  ;;  %v443_v12 = vld [vmem:[%s909_s2] ss:$0 sm:$0xff]  ;;  %p335_p13 = scmp.lt.s32.totalorder (%p919_p4), %s334_s30, 2 }
  0x57   : > { %473 = vmatprep.subr.mxu0 %v229_v2 }
  0x58   : > { %474 = vmatpush3.msra.mxu0 %v229_v2 }
  0x59   : > { %475 = vmatprep.subr.mxu0 %v228_v4 }
  0x5a   : > { %476 = vmatpush3.msra.mxu0 %v228_v4 }
  0x5b   : > { %477 = vmatprep.subr.mxu0 %v227_v5 }
  0x5c   : > { %478 = vmatpush3.msra.mxu0 %v227_v5 }
  0x5d   : > { %479 = vmatprep.subr.mxu0 %v226_v6 }
  0x5e   : > { %480 = vmatpush3.msra.mxu0 %v226_v6 }
  0x5f   : > { %481 = vmatprep.subr.mxu0 %v225_v7 }
  0x60   : > { %482 = vmatpush3.msra.mxu0 %v225_v7 }
  0x61   : > { %483 = vmatprep.subr.mxu0 %v224_v8 }
  0x62   : > { %484 = vmatpush3.msra.mxu0 %v224_v8 }
  0x63   : > { %485 = vmatprep.subr.mxu0 %v223_v9 }
  0x64   : > { %486 = vmatpush3.msra.mxu0 %v223_v9 }
  0x65   : > { %487 = vmatprep.subr.mxu0 %v222_v10 }
  0x66   : > { %488 = vmatpush3.msra.mxu0 %v222_v10 }
  0x67   : > { %490 = vmatmul.mubr.msk.f32.vlgmr.msra.gmra.mxu0 %vm239_vm0, %v221_v11 }
 0x127   : > { %v491_v13 = vpop.f32.mrf.mxu0 }
 0x128   : > { %v318_v14 = vadd.f32 %v491_v13, %v443_v12 }
 0x129   : > { %v312_v15 = vpop.f32.mrf.mxu0 }
 0x12a   : > { %v322_v16 = vadd.f32 %v318_v14, %v221_v11  ;;  %v313_v17 = vadd.f32 %v443_v12, %v312_v15  ;;  %332 = sbr.rel (!%p919_p4) target bundleno = 330 (0x14a), region = 44 }
 0x12c   : > { %324 = vst.msk [vmem:[%s209_s11 + $0x8] sm:$0xff] %vm239_vm0, %v322_v16  ;;  %v321_v18 = vadd.f32 %v313_v17, %v220_v3 }
 0x12e   : > { %323 = vst.msk [vmem:[%s209_s11] sm:$0xff] %vm239_vm0, %v321_v18 }
 0x12f   : > { %s929_s30 = smov (!%p335_p13, %s334_s30), 2 }
 0x130   : > { %s850_s8 = sshll.u32 %s929_s30, 7 }
 0x131   : > { %s339_s9 = ssub.s32 256, %s850_s8 }
 0x132   : > { %340 = vsyncadd %s326_s19, %s339_s9  ;;  %p449_p5 = scmp.ne.s32.totalorder %s850_s8, 0  ;;  %s456_s10 = sshll.u32 %s720_s16, 8 }
 0x133   : > { %s860_s20 = scalar_lea.hbm %s910_s3, %s456_s10  ;;  %s345_s22 = sshll.u32 %s209_s11, 4  ;;  %s862_s22 = int_to_ptr.vmem [resolvable:$true] %s345_s22 }
 0x134   : > { %s600_s27 = scalar_lea.vmem %s862_s22, %s850_s8  ;;  %s676_s28 = smov [#allocation7]  }
 0x135   : > { %p601_p1 = scmp.ne.s32.totalorder %s862_s22, %s600_s27  ;;  %s604_s5 = sshll.u32 %s676_s28, 4  ;;  %s605_s5 = int_to_ptr.vmem [resolvable:$false] %s604_s5 }
 0x136   : > { %s606_s16 = scalar_lea.vmem %s605_s5, 512  ;;  %p607_p3 = scmp.lt.s32.totalorder %s862_s22, %s605_s5 }
 0x137   : > { %p602_p0 = pnand %p601_p1, %p449_p5  ;;  %p608_p8 = scmp.lt.s32.totalorder %s606_s16, %s600_s27 }
 0x139   : > { %p603_p7 = pneg %p602_p0  ;;  %p609_p9 = por %p608_p8, %p607_p3 }
 0x13b   : > { %p610_p6 = pnand %p609_p9, %p603_p7 }
 0x13d   : > { %613 = shalt.err (!%p610_p6)
}
 0x13e   : > { %s614_s6 = scalar_lea.hbm %s860_s20, %s850_s8  ;;  %s618_s26 = scalar_lea.hbm %s910_s3, 384 }
 0x13f   : > { %p615_p11 = scmp.ne.s32.totalorder %s860_s20, %s614_s6  ;;  %p619_p10 = scmp.lt.s32.totalorder %s860_s20, %s910_s3 }
 0x140   : > { %p620_p4 = scmp.lt.s32.totalorder %s618_s26, %s614_s6 }
 0x141   : > { %p616_p12 = pnand %p615_p11, %p449_p5 }
 0x142   : > { %p621_p13 = por %p620_p4, %p619_p10 }
 0x143   : > { %p617_p2 = pneg %p616_p12 }
 0x145   : > { %p622_p1 = pnand %p621_p13, %p617_p2 }
 0x147   : > { %625 = shalt.err (!%p622_p1)
}
 0x148   : > { %s677_s30 = smov 128   ;;  %s678_s9 = smov 8  }
 0x149   : > { %351 = dma.vmem_to_hbm [thread:$0]  (%p449_p5), %s862_s22, %s850_s8, %s860_s20, %s326_s19, %s677_s30, %s677_s30, %s678_s9  }
 0x14a PF: > { %s360_s10 = sand.u32 1, %s656_s12   ;;  %p920_p0 = scmp.ne.s32.totalorder %s916_s25, 0 }
 0x14b   : > { %p921_p7 = scmp.ge.s32.totalorder %s668_s15, 2  ;;  %s361_s24 = scalar_lea.sflag [#allocation4], %s360_s10 }
 0x14d   : > { %p503_p3 = pnand %p921_p7, %p920_p0 }
 0x14f   : > { %p504_p8 = pneg %p503_p3 }
 0x151   : > { %651 = dma.done.wait (%p504_p8), %s361_s24, 256  }
 0x152   : > { %653 = vsyncadd (%p504_p8), %s361_s24, 4294967040  ;;  %p17_p9 = scmp.ge.s32.totalorder %s724_s18, 4   ;;  %s922_s12 = smov %s660_s13 }
 0x153   : > { %s923_s13 = smov %s664_s14  ;;  %s924_s14 = smov %s736_s21 }
 0x154   : > { %s925_s15 = smov %s724_s18  ;;  %19 = sbr.rel (!%p17_p9) target bundleno = 6 (0x6), region = 81 }
 0x159   :  { %366 = vsyncpa [#allocation3], 1 }
 0x15a   :  { %368 = vsyncpa [#allocation3 + $0x1], 1 }
 0x15b   :  { %369 = vsyncpa [#allocation6], 1 }
 0x15c   :  { %370 = vsyncpa [#allocation4], 1 }
 0x15d   :  { %372 = vsyncpa [#allocation4 + $0x1], 1 }

</bundles_post_ra>
